<compile_context>
chip_gen: v7x
topology: tpu7x:2x2x1
jax: 0.10.0
libtpu: 0.0.40
codegen_flags: <defaults>
</compile_context>

<pallas_src>
import functools

import jax
import jax.numpy as jnp
from jax.experimental import pallas as pl
from jax.experimental.pallas import tpu as pltpu

IN_SIZE = 16       # channels (divisible by reduction)
REDUCTION = 4
BN_EPS = 1e-5


# --------------------------------- kernel -----------------------------------
def _se_kernel(x_ref, w1_ref, b1_ref, w2_ref, b2_ref, o_ref, *, inv_m):
    """Fused squeeze-excite for a block of Nb batch elements.

    x_ref : (Nb, C, Mp)  activations, Mp = padded H*W on the lane axis
    w1_ref: (C, Cr)      conv1 weight (transposed, BN1 scale folded in)
    b1_ref: (1, Cr)      folded BN1 bias
    w2_ref: (C, Cr)      conv2 weight (BN2 scale folded in)
    b2_ref: (C, 1)       folded BN2 bias
    o_ref : (Nb, C, Mp)  x * gate   (stored in the source dtype)
    inv_m : 1 / (true H*W)  -- padding lanes are zero, so sum*inv_m == mean
    """
    x = x_ref[...].astype(jnp.float32)                         # (Nb, C, Mp)

    # global average pool over spatial -> (Nb, C, 1)
    pooled = jnp.sum(x, axis=-1, keepdims=True) * inv_m

    # 1x1 conv C->Cr (+ folded BN1) as VPU broadcast-MAC + sublane reduce,
    # then ReLU:  (1,C,Cr)*(Nb,C,1) -> (Nb,C,Cr) -> reduce C -> (Nb,1,Cr)
    h = jnp.sum(w1_ref[...][None, :, :] * pooled, axis=1, keepdims=True)
    h = jnp.maximum(h + b1_ref[...], 0.0)                      # (Nb, 1, Cr)

    # 1x1 conv Cr->C (+ folded BN2) as broadcast-MAC + lane reduce:
    # (1,C,Cr)*(Nb,1,Cr) -> (Nb,C,Cr) -> reduce Cr -> (Nb,C,1)
    g = jnp.sum(w2_ref[...][None, :, :] * h, axis=-1, keepdims=True)
    g = g + b2_ref[...]                                        # (Nb, C, 1)

    # hard-sigmoid: relu6(g + 3) / 6   (f32 epilogue, constant multiply)
    gate = jnp.clip(g + 3.0, 0.0, 6.0) * (1.0 / 6.0)

    # per-channel gating, gate broadcast over the Mp lanes; cast only on store
    o_ref[...] = (x * gate).astype(o_ref.dtype)


# ------------------------------- wrapper -------------------------------------
def se_module_forward(x_nchw, folded):
    N, C, H, W = x_nchw.shape
    M = H * W
    dtype = x_nchw.dtype
    Cr = folded["w1"].shape[1]

    # NCHW is already (C, M)-major -> pure reshape, no transpose.
    x3 = x_nchw.reshape(N, C, M)

    # Lane-density guard: pad spatial axis to a multiple of 128 (unmasked vst).
    M_pad = ((M + 127) // 128) * 128
    if M_pad != M:
        x3 = jnp.pad(x3, ((0, 0), (0, 0), (0, M_pad - M)))

    # Choose the batch block so each grid step moves ~1 MiB of activations,
    # but keep >= 2 grid steps (when N >= 2) so v7x megacore sharding applies.
    itemsize = jnp.dtype(dtype).itemsize
    per_elem_bytes = C * M_pad * itemsize
    nb = max(1, (1 << 20) // per_elem_bytes)
    if N >= 2:
        nb = min(nb, (N + 1) // 2)
    nb = int(min(nb, N))

    # Pad batch to a multiple of nb (padded rows are zero -> zero output).
    N_pad = ((N + nb - 1) // nb) * nb
    if N_pad != N:
        x3 = jnp.pad(x3, ((0, N_pad - N), (0, 0), (0, 0)))
    grid = (N_pad // nb,)

    # Only raise the scoped-VMEM limit when the double-buffered in+out blocks
    # actually need it (keeps the budget safe on v7x's 64 MiB VMEM).
    step_bytes = 2 * 2 * nb * C * M_pad * itemsize
    cp_kwargs = dict(dimension_semantics=("parallel",))
    if step_bytes > 24 * 1024 * 1024:
        cp_kwargs["vmem_limit_bytes"] = min(step_bytes + (8 << 20), 100 << 20)

    kernel = functools.partial(_se_kernel, inv_m=1.0 / float(M))

    out = pl.pallas_call(
        kernel,
        grid=grid,
        in_specs=[
            pl.BlockSpec((nb, C, M_pad), lambda n: (n, 0, 0)),
            pl.BlockSpec((C, Cr), lambda n: (0, 0)),
            pl.BlockSpec((1, Cr), lambda n: (0, 0)),
            pl.BlockSpec((C, Cr), lambda n: (0, 0)),
            pl.BlockSpec((C, 1), lambda n: (0, 0)),
        ],
        out_specs=pl.BlockSpec((nb, C, M_pad), lambda n: (n, 0, 0)),
        out_shape=jax.ShapeDtypeStruct((N_pad, C, M_pad), dtype),
        compiler_params=pltpu.CompilerParams(**cp_kwargs),
    )(x3, folded["w1"], folded["b1"], folded["w2"], folded["b2"])

    out = out[:N, :, :M]
    return out.reshape(N, C, H, W)


# ----------------------- deterministic parameters ----------------------------
def init_params(key, in_size=IN_SIZE, reduction=REDUCTION):
    """Returns (raw PyTorch-style params, BN-folded kernel params)."""
    cr = in_size // reduction
    ks = jax.random.split(key, 10)

    w1 = jax.random.normal(ks[0], (cr, in_size), jnp.float32) * 0.2   # conv1 (out, in)
    w2 = jax.random.normal(ks[1], (in_size, cr), jnp.float32) * 0.2   # conv2 (out, in)
    g1 = jax.random.uniform(ks[2], (cr,), jnp.float32, minval=0.5, maxval=1.5)
    be1 = jax.random.normal(ks[3], (cr,), jnp.float32) * 0.1
    m1 = jax.random.normal(ks[4], (cr,), jnp.float32) * 0.1
    v1 = jax.random.uniform(ks[5], (cr,), jnp.float32, minval=0.5, maxval=1.5)
    g2 = jax.random.uniform(ks[6], (in_size,), jnp.float32, minval=0.5, maxval=1.5)
    be2 = jax.random.normal(ks[7], (in_size,), jnp.float32) * 0.1
    m2 = jax.random.normal(ks[8], (in_size,), jnp.float32) * 0.1
    v2 = jax.random.uniform(ks[9], (in_size,), jnp.float32, minval=0.5, maxval=1.5)

    raw = dict(w1=w1, w2=w2, g1=g1, be1=be1, m1=m1, v1=v1,
               g2=g2, be2=be2, m2=m2, v2=v2)

    # Fold BN (inference form) into the conv weights / biases.
    s1 = g1 * jax.lax.rsqrt(v1 + BN_EPS)
    s2 = g2 * jax.lax.rsqrt(v2 + BN_EPS)
    folded = {
        "w1": (w1 * s1[:, None]).T,                 # (C, Cr): BN1 scale on out-chs
        "b1": (be1 - m1 * s1).reshape(1, cr),       # (1, Cr)
        "w2": w2 * s2[:, None],                     # (C, Cr)
        "b2": (be2 - m2 * s2).reshape(in_size, 1),  # (C, 1)
    }
    return raw, folded


# ----------------------------- pure-JAX reference ----------------------------
def se_reference(x_nchw, raw):
    x = x_nchw.astype(jnp.float32)
    pooled = jnp.mean(x, axis=(2, 3), keepdims=True)                 # (N, C, 1, 1)
    h = jnp.einsum("nchw,jc->njhw", pooled, raw["w1"])               # conv1, no bias
    s1 = raw["g1"] * jax.lax.rsqrt(raw["v1"] + BN_EPS)
    h = (h - raw["m1"][None, :, None, None]) * s1[None, :, None, None] \
        + raw["be1"][None, :, None, None]
    h = jnp.maximum(h, 0.0)
    e = jnp.einsum("njhw,cj->nchw", h, raw["w2"])                    # conv2, no bias
    s2 = raw["g2"] * jax.lax.rsqrt(raw["v2"] + BN_EPS)
    e = (e - raw["m2"][None, :, None, None]) * s2[None, :, None, None] \
        + raw["be2"][None, :, None, None]
    gate = jnp.clip(e + 3.0, 0.0, 6.0) / 6.0                         # hsigmoid
    return x * gate


# ----------------------------------- main ------------------------------------
if __name__ == "__main__":
    key = jax.random.PRNGKey(0)
    pkey, xkey, xkey2 = jax.random.split(key, 3)
    raw, folded = init_params(pkey)

    # --- test 1: small f32, M already lane-dense (16*16 = 256) ---------------
    x = jax.random.normal(xkey, (2, IN_SIZE, 16, 16), jnp.float32)
    fwd = jax.jit(lambda inp: se_module_forward(inp, folded))
    out = fwd(x)
    jax.block_until_ready(out)

    ref = se_reference(x, raw)
    assert out.shape == x.shape and out.dtype == x.dtype, (out.shape, out.dtype)
    assert jnp.all(jnp.isfinite(out))
    assert jnp.allclose(out, ref, rtol=1e-4, atol=1e-4), \
        float(jnp.max(jnp.abs(out - ref)))

    # --- test 2: bf16 I/O, batch-blocked (Nb>1) and lane-padded (12*12=144) --
    xb = jax.random.normal(xkey2, (6, IN_SIZE, 12, 12), jnp.float32).astype(jnp.bfloat16)
    outb = jax.jit(lambda inp: se_module_forward(inp, folded))(xb)
    jax.block_until_ready(outb)

    refb = se_reference(xb, raw)
    assert outb.shape == xb.shape and outb.dtype == jnp.bfloat16
    assert jnp.all(jnp.isfinite(outb.astype(jnp.float32)))
    assert jnp.allclose(outb.astype(jnp.float32), refb, rtol=2e-2, atol=2e-2), \
        float(jnp.max(jnp.abs(outb.astype(jnp.float32) - refb)))

    print("KERNEL_OK")
</pallas_src>

<mosaic_0001>
module attributes {stable_mosaic.version = 11 : i64} {
  func.func @_se_kernel(%arg0: i32, %arg1: memref<1x16x256xf32, #tpu.memory_space<vmem>>, %arg2: memref<16x4xf32, #tpu.memory_space<vmem>>, %arg3: memref<1x4xf32, #tpu.memory_space<vmem>>, %arg4: memref<16x4xf32, #tpu.memory_space<vmem>>, %arg5: memref<16x1xf32, #tpu.memory_space<vmem>>, %arg6: memref<1x16x256xf32, #tpu.memory_space<vmem>>) attributes {dimension_semantics = [#tpu.dimension_semantics<parallel>], iteration_bounds = array<i64: 2>, scalar_prefetch = 0 : i64, scratch_operands = 0 : i64, tpu.core_type = #tpu.core_type<tc>, window_params = [{transform_indices = @transform_0, window_bounds = array<i64: 1, 16, 256>}, {pipeline_mode = #tpu.pipeline_mode<synchronous>, transform_indices = @transform_1, window_bounds = array<i64: 16, 4>}, {pipeline_mode = #tpu.pipeline_mode<synchronous>, transform_indices = @transform_2, window_bounds = array<i64: 1, 4>}, {pipeline_mode = #tpu.pipeline_mode<synchronous>, transform_indices = @transform_3, window_bounds = array<i64: 16, 4>}, {pipeline_mode = #tpu.pipeline_mode<synchronous>, transform_indices = @transform_4, window_bounds = array<i64: 16, 1>}, {transform_indices = @transform_5, window_bounds = array<i64: 1, 16, 256>}]} {
    %c0 = arith.constant 0 : index
    %c0_0 = arith.constant 0 : index
    %c0_1 = arith.constant 0 : index
    %0 = vector.load %arg1[%c0, %c0_0, %c0_1] : memref<1x16x256xf32, #tpu.memory_space<vmem>>, vector<1x16x256xf32>
    %cst = arith.constant dense<0.000000e+00> : vector<1x16xf32>
    %1 = vector.multi_reduction <add>, %0, %cst [2] : vector<1x16x256xf32> to vector<1x16xf32>
    %2 = vector.shape_cast %1 : vector<1x16xf32> to vector<1x16x1xf32>
    %cst_2 = arith.constant 3.906250e-03 : f32
    %3 = vector.broadcast %cst_2 : f32 to vector<1x16x1xf32>
    %4 = arith.mulf %2, %3 : vector<1x16x1xf32>
    %c0_3 = arith.constant 0 : index
    %c0_4 = arith.constant 0 : index
    %5 = vector.load %arg2[%c0_3, %c0_4] : memref<16x4xf32, #tpu.memory_space<vmem>>, vector<16x4xf32>
    %6 = vector.shape_cast %5 : vector<16x4xf32> to vector<1x16x4xf32>
    %7 = vector.broadcast %4 : vector<1x16x1xf32> to vector<1x16x4xf32>
    %8 = arith.mulf %6, %7 : vector<1x16x4xf32>
    %cst_5 = arith.constant dense<0.000000e+00> : vector<1x4xf32>
    %9 = vector.multi_reduction <add>, %8, %cst_5 [1] : vector<1x16x4xf32> to vector<1x4xf32>
    %10 = vector.shape_cast %9 : vector<1x4xf32> to vector<1x1x4xf32>
    %c0_6 = arith.constant 0 : index
    %c0_7 = arith.constant 0 : index
    %11 = vector.load %arg3[%c0_6, %c0_7] : memref<1x4xf32, #tpu.memory_space<vmem>>, vector<1x4xf32>
    %12 = vector.shape_cast %11 : vector<1x4xf32> to vector<1x1x4xf32>
    %13 = arith.addf %10, %12 : vector<1x1x4xf32>
    %cst_8 = arith.constant 0.000000e+00 : f32
    %14 = vector.broadcast %cst_8 : f32 to vector<1x1x4xf32>
    %15 = arith.maximumf %13, %14 : vector<1x1x4xf32>
    %c0_9 = arith.constant 0 : index
    %c0_10 = arith.constant 0 : index
    %16 = vector.load %arg4[%c0_9, %c0_10] : memref<16x4xf32, #tpu.memory_space<vmem>>, vector<16x4xf32>
    %17 = vector.shape_cast %16 : vector<16x4xf32> to vector<1x16x4xf32>
    %18 = vector.broadcast %15 : vector<1x1x4xf32> to vector<1x16x4xf32>
    %19 = arith.mulf %17, %18 : vector<1x16x4xf32>
    %cst_11 = arith.constant dense<0.000000e+00> : vector<1x16xf32>
    %20 = vector.multi_reduction <add>, %19, %cst_11 [2] : vector<1x16x4xf32> to vector<1x16xf32>
    %21 = vector.shape_cast %20 : vector<1x16xf32> to vector<1x16x1xf32>
    %c0_12 = arith.constant 0 : index
    %c0_13 = arith.constant 0 : index
    %22 = vector.load %arg5[%c0_12, %c0_13] : memref<16x1xf32, #tpu.memory_space<vmem>>, vector<16x1xf32>
    %23 = vector.shape_cast %22 : vector<16x1xf32> to vector<1x16x1xf32>
    %24 = arith.addf %21, %23 : vector<1x16x1xf32>
    %cst_14 = arith.constant 3.000000e+00 : f32
    %25 = vector.broadcast %cst_14 : f32 to vector<1x16x1xf32>
    %26 = arith.addf %24, %25 : vector<1x16x1xf32>
    %cst_15 = arith.constant 0.000000e+00 : f32
    %cst_16 = arith.constant 6.000000e+00 : f32
    %27 = vector.broadcast %cst_15 : f32 to vector<1x16x1xf32>
    %28 = arith.maximumf %27, %26 : vector<1x16x1xf32>
    %29 = vector.broadcast %cst_16 : f32 to vector<1x16x1xf32>
    %30 = arith.minimumf %29, %28 : vector<1x16x1xf32>
    %cst_17 = arith.constant 0.166666672 : f32
    %31 = vector.broadcast %cst_17 : f32 to vector<1x16x1xf32>
    %32 = arith.mulf %30, %31 : vector<1x16x1xf32>
    %33 = vector.broadcast %32 : vector<1x16x1xf32> to vector<1x16x256xf32>
    %34 = arith.mulf %0, %33 : vector<1x16x256xf32>
    %c0_18 = arith.constant 0 : index
    %c0_19 = arith.constant 0 : index
    %c0_20 = arith.constant 0 : index
    %35 = vector.load %arg6[%c0_18, %c0_19, %c0_20] : memref<1x16x256xf32, #tpu.memory_space<vmem>>, vector<1x16x256xf32>
    tpu.vector_store %arg6[%c0_18, %c0_19, %c0_20], %34 {strides = array<i32>} : memref<1x16x256xf32, #tpu.memory_space<vmem>>, vector<1x16x256xf32>,
    return
  }
  func.func @transform_0(%arg0: i32) -> (i32, i32, i32) {
    %c0_i32 = arith.constant 0 : i32
    %c0_i32_0 = arith.constant 0 : i32
    %c0_i32_1 = arith.constant 0 : i32
    return %arg0, %c0_i32, %c0_i32_0 : i32, i32, i32
  }
  func.func @transform_1(%arg0: i32) -> (i32, i32) {
    %c0_i32 = arith.constant 0 : i32
    %c0_i32_0 = arith.constant 0 : i32
    %c0_i32_1 = arith.constant 0 : i32
    return %c0_i32, %c0_i32_0 : i32, i32
  }
  func.func @transform_2(%arg0: i32) -> (i32, i32) {
    %c0_i32 = arith.constant 0 : i32
    %c0_i32_0 = arith.constant 0 : i32
    %c0_i32_1 = arith.constant 0 : i32
    return %c0_i32, %c0_i32_0 : i32, i32
  }
  func.func @transform_3(%arg0: i32) -> (i32, i32) {
    %c0_i32 = arith.constant 0 : i32
    %c0_i32_0 = arith.constant 0 : i32
    %c0_i32_1 = arith.constant 0 : i32
    return %c0_i32, %c0_i32_0 : i32, i32
  }
  func.func @transform_4(%arg0: i32) -> (i32, i32) {
    %c0_i32 = arith.constant 0 : i32
    %c0_i32_0 = arith.constant 0 : i32
    %c0_i32_1 = arith.constant 0 : i32
    return %c0_i32, %c0_i32_0 : i32, i32
  }
  func.func @transform_5(%arg0: i32) -> (i32, i32, i32) {
    %c0_i32 = arith.constant 0 : i32
    %c0_i32_0 = arith.constant 0 : i32
    %c0_i32_1 = arith.constant 0 : i32
    return %arg0, %c0_i32, %c0_i32_0 : i32, i32, i32
  }
}

</mosaic_0001>

<bundles_post_ra>
// kernel: _lambda_.1
= control target key start
LH: loop header
LB: loop body
LE: loop exit
PB: predicated region body
PF: predicated region fallthrough
CT: control target
= control target key end

     0   :  { %s416_s18 = smov 0   ;;  %s473_s0 = inlined_call_operand.vmem [shape: f32[2,16,256], index: 0, kind: input, shape index: {}]   ;;  %s474_s1 = inlined_call_operand.vmem [shape: f32[16,4], index: 1, kind: input, shape index: {}]   ;;  %s475_s2 = inlined_call_operand.vmem [shape: f32[1,4], index: 2, kind: input, shape index: {}]   ;;  %s476_s3 = inlined_call_operand.vmem [shape: f32[16,4], index: 3, kind: input, shape index: {}]   ;;  %s477_s4 = inlined_call_operand.vmem [shape: f32[16,1], index: 4, kind: input, shape index: {}]   ;;  %s478_s5 = inlined_call_operand.vmem [shape: f32[2,16,256], index: 5, kind: output, shape index: {}]  }
   0x1 LB: > { %s353_s19 = sadd.s32 4294967295, %s383_s18   ;;  %p357_p0 = scmp.ge.s32.totalorder %s383_s18, 1  ;;  %s383_s18 = sphi %s416_s18, %s15_s18  }
   0x2   : > { %p187_p1 = scmp.lt.s32.totalorder %s383_s18, 3 }
   0x4   : > { %p188_p2 = pnand %p357_p0, %p187_p1 }
   0x5   : > { %p215_p3 = scmp.lt.s32.totalorder (!%p188_p2), %s353_s19, 1  ;;  %v237_v8 = vld [vmem:[%s474_s1] sm:$0xff] (!%p188_p2)  ;;  %v238_v9 = vld [vmem:[%s474_s1 + $0x8] sm:$0xff] (!%p188_p2)  ;;  %vm241_vm0 = vcmask (!%p188_p2), 31744   ;;  %v256_v20 = vlaneseq (!%p188_p2)  ;;  %v385_v36 = vmov (!%p188_p2), 0  }
   0x6   : > { %191 = sbr.rel (%p188_p2) target bundleno = 480 (0x1e0), region = 40  ;;  %v251_v24 = vld [vmem:[%s475_s2] sm:$0x1] (!%p188_p2)  ;;  %v255_v31 = vld [vmem:[%s476_s3 + $0x8] sm:$0xff] (!%p188_p2)  ;;  %375 = vset.pattern.permute.xlu0 (!%p188_p2), %v385_v36  ;;  %376 = vset.pattern.permute.xlu1 (!%p188_p2), %v385_v36 }
   0x7   : > { %v257_v23 = vshrl.u32 (!%p188_p2), %v256_v20, 7  ;;  %v254_v29 = vld [vmem:[%s476_s3] sm:$0xff] (!%p188_p2)  ;;  %v269_v40 = vld [vmem:[%s477_s4 + $0x8] sm:$0xff] (!%p188_p2) }
   0x8   : > { %v268_v37 = vld [vmem:[%s477_s4] sm:$0xff] (!%p188_p2) }
   0x9   : > { %v258_v27 = vsub.s32 (!%p188_p2), 0, %v257_v23 }
   0xd   : > { %s480_s19 = smov (!%p215_p3, %s353_s19), 1 }
   0xe   : > { %s364_s20 = sshll.u32 %s480_s19, 5 }
   0xf   : > { %s219_s23 = scalar_lea.vmem %s473_s0, %s364_s20  ;;  %s224_s15 = scalar_lea.vmem %s478_s5, %s364_s20 }
  0x10   : > { %v225_v0 = vld [vmem:[%s219_s23] sm:$0xff]  ;;  %v226_v1 = vld [vmem:[%s219_s23 + $0x8] sm:$0xff]  ;;  %v432_v2 = vld [vmem:[%s219_s23 + $0x10] sm:$0xff] }
  0x11   : > { %v229_v3 = vadd.f32 %v226_v1, %v225_v0  ;;  %v434_v4 = vld [vmem:[%s219_s23 + $0x18] sm:$0xff] }
  0x12   : > { %v232_v5 = vadd.f32 %v434_v4, %v432_v2 }
  0x13   : > { %230 = vadd.xlane.f32.xlu0 %v229_v3 }
  0x17   : > { %233 = vadd.xlane.f32.xlu0 %v232_v5 }
  0xa0   : > { %v231_v6 = vpop.xlane.xlu0 %230 }
  0xa1   : > { %v235_v7 = vmul.f32 0.00390625, %v231_v6 }
  0xa3   : > { %v239_v11 = vmul.f32 %v237_v8, %v235_v7 }
  0xa4   : > { %v234_v10 = vpop.xlane.xlu0 %233 }
  0xa5   : > { %v236_v12 = vmul.f32 0.00390625, %v234_v10  ;;  %v242_v14 = vsel %vm241_vm0, %v239_v11, 0.0 }
  0xa7   : > { %v240_v13 = vmul.f32 %v238_v9, %v236_v12 }
  0xa9   : > { %v243_v15 = vsel %vm241_vm0, %v240_v13, 0.0 }
  0xaa   : > { %v244_v16 = vadd.f32 %v243_v15, %v242_v14 }
  0xac   : > { %v245_v17 = vrot.slane %v244_v16, 4 }
  0xae   : > { %v246_v18 = vadd.f32 %v245_v17, %v244_v16 }
  0xb0   : > { %v247_v19 = vrot.slane %v246_v18, 2 }
  0xb2   : > { %v248_v21 = vadd.f32 %v247_v19, %v246_v18 }
  0xb4   : > { %v249_v22 = vrot.slane %v248_v21, 1 }
  0xb6   : > { %v250_v25 = vadd.f32 %v249_v22, %v248_v21 }
  0xb8   : > { %v252_v26 = vadd.f32 %v251_v24, %v250_v25 }
  0xba   : > { %v253_v28 = vmax.f32 %v252_v26, 0.0 }
  0xbc   : > { %v259_v30 = vrot.slane %v253_v28, %v258_v27 }
  0xbe   : > { %v260_v32 = vmul.f32 %v259_v30, %v254_v29  ;;  %v261_v34 = vmul.f32 %v259_v30, %v255_v31 }
  0xc0   : > { %v262_v33 = vsel %vm241_vm0, %v260_v32, 0.0  ;;  %v265_v35 = vsel %vm241_vm0, %v261_v34, 0.0 }
  0xc1   : > { %263 = vadd.xlane.f32.xlu1 %v262_v33 }
  0xc5   : > { %266 = vadd.xlane.f32.xlu1 %v265_v35 }
 0x14e   : > { %v264_v38 = vpop.xlane.xlu1 %263 }
 0x14f   : > { %v270_v39 = vadd.f32 %v268_v37, %v264_v38 }
 0x151   : > { %v272_v41 = vadd.f32 3.0, %v270_v39 }
 0x152   : > { %v267_v42 = vpop.xlane.xlu1 %266 }
 0x153   : > { %v274_v43 = vmax.f32 %v272_v41, 0.0  ;;  %v271_v44 = vadd.f32 %v269_v40, %v267_v42 }
 0x155   : > { %v276_v45 = vmin.f32 %v274_v43, 6.0  ;;  %v273_v46 = vadd.f32 3.0, %v271_v44 }
 0x157   : > { %v278_v47 = vmul.f32 0.16666667, %v276_v45  ;;  %v275_v48 = vmax.f32 %v273_v46, 0.0 }
 0x159   : > { %v277_v49 = vmin.f32 %v275_v48, 6.0  ;;  %282 = vperm.xlu0 %375, %v278_v47  }
 0x15b   : > { %v279_v50 = vmul.f32 0.16666667, %v277_v49 }
 0x15d   : > { %287 = vperm.xlu1 %376, %v279_v50  }
 0x1d8   : > { %v283_v51 = vpop.permute.xlu0 %282 }
 0x1d9   : > { %v290_v52 = vmul.f32 %v283_v51, %v225_v0  ;;  %v291_v53 = vmul.f32 %v283_v51, %v226_v1 }
 0x1db   : > { %294 = vst [vmem:[%s224_s15] sm:$0xff] %v290_v52  ;;  %295 = vst [vmem:[%s224_s15 + $0x8] sm:$0xff] %v291_v53 }
 0x1dc   : > { %v288_v54 = vpop.permute.xlu1 %287 }
 0x1dd   : > { %v292_v55 = vmul.f32 %v288_v54, %v432_v2  ;;  %v293_v56 = vmul.f32 %v288_v54, %v434_v4 }
 0x1df   : > { %296 = vst [vmem:[%s224_s15 + $0x10] sm:$0xff] %v292_v55  ;;  %297 = vst [vmem:[%s224_s15 + $0x18] sm:$0xff] %v293_v56 }
 0x1e0 PF: > { %s15_s18 = sadd.s32 1, %s383_s18  }
 0x1e1   : > { %p12_p4 = scmp.ge.s32.totalorder %s15_s18, 4  }
 0x1e3   :  { %14 = sbr.rel (!%p12_p4) target bundleno = 1 (0x1), region = 70 }

</bundles_post_ra>
